<compile_context>
chip_gen: v7x
topology: tpu7x:2x2x1
jax: 0.10.0
libtpu: 0.0.40
codegen_flags: <defaults>
</compile_context>

<pallas_src>
import functools

import jax
import jax.numpy as jnp
from jax.experimental import pallas as pl
from jax.experimental.pallas import tpu as pltpu

_LANE = 128  # feature channels are zero-padded to one full lane width


def _round_up(x, m):
    return ((x + m - 1) // m) * m


# ----------------------------------------------------------------------------
# Fused 2-layer GCN kernel
# ----------------------------------------------------------------------------
def _fused_gcn_kernel(adj_ref, dr_ref, dc_ref, x_ref, w1_ref, b1_ref,
                      w2_ref, b2_ref, o_ref, acc_ref, g_ref, *, tile):
    p = pl.program_id(0)       # phase: 0 = layer 1, 1 = layer 2
    i = pl.program_id(1)       # output row tile
    k = pl.program_id(2)       # contraction tile over nodes
    nk = pl.num_programs(2)

    @pl.when(k == 0)
    def _init():
        acc_ref[...] = jnp.zeros_like(acc_ref)

    # Symmetric D^{-1/2} normalization folded in on the VPU (free under the
    # MXU/DMA bottleneck):  S[i,k] = dinv[i] * A_hat[i,k] * dinv[k]
    s_tile = (adj_ref[...].astype(jnp.float32) * dr_ref[...] * dc_ref[...]
              ).astype(jnp.bfloat16)

    @pl.when(p == 0)
    def _phase0():
        # Layer 1, association (S @ X) @ W1: the N^2-scale matmul contracts
        # over the node axis with a lane-dense [tile, 128] X slab.
        acc_ref[...] += jnp.dot(s_tile, x_ref[...],
                                preferred_element_type=jnp.float32)

        @pl.when(k == nk - 1)
        def _finalize0():
            h = jnp.maximum(
                jnp.dot(acc_ref[...].astype(jnp.bfloat16), w1_ref[...],
                        preferred_element_type=jnp.float32) + b1_ref[...],
                0.0)
            g = jnp.dot(h.astype(jnp.bfloat16), w2_ref[...],
                        preferred_element_type=jnp.float32)
            row0 = pl.multiple_of(i * tile, tile)
            g_ref[pl.ds(row0, tile), :] = g.astype(g_ref.dtype)
            # Defined (throwaway) data for this block's phase-0 writeback;
            # phase 1 overwrites it with the real result.
            o_ref[...] = g.astype(o_ref.dtype)

    @pl.when(p == 1)
    def _phase1():
        row0 = pl.multiple_of(k * tile, tile)
        acc_ref[...] += jnp.dot(s_tile, g_ref[pl.ds(row0, tile), :],
                                preferred_element_type=jnp.float32)

        @pl.when(k == nk - 1)
        def _finalize1():
            o_ref[...] = (acc_ref[...] + b2_ref[...]).astype(o_ref.dtype)


# ----------------------------------------------------------------------------
# Wrapper: adjacency glue + padding + pallas_call
# ----------------------------------------------------------------------------
def gcn_encoder(x, edge_index, params, *, tile=256):
    n, in_ch = x.shape
    hid = params["w1"].shape[1]
    out_ch = params["w2"].shape[1]
    # TODO(synk): tile the feature axis as well to support >128 channels.
    assert max(in_ch, hid, out_ch) <= _LANE

    tile = min(tile, _round_up(n, _LANE))
    n_pad = _round_up(n, tile)
    nk = n_pad // tile

    # ---- glue: build A_hat (sparse scatter) and deg^{-1/2} in XLA ----------
    # PyG convention: edge_index[0] = source, edge_index[1] = target.
    src, dst = edge_index[0], edge_index[1]
    loop = jnp.arange(n, dtype=edge_index.dtype)
    src = jnp.concatenate([src, loop])
    dst = jnp.concatenate([dst, loop])
    adj = jnp.zeros((n_pad, n_pad), jnp.bfloat16)
    adj = adj.at[dst, src].add(jnp.ones_like(dst, dtype=jnp.bfloat16))
    deg = jnp.zeros((n_pad,), jnp.float32).at[dst].add(1.0)
    dinv = jnp.where(deg > 0, jax.lax.rsqrt(deg), 0.0)
    dinv_row = dinv.reshape(n_pad, 1)
    dinv_col = dinv.reshape(1, n_pad)
    # TODO(synk): for genuinely sparse graphs replace the dense A_hat with a
    # CSR scalar-prefetch gather kernel so HBM bytes scale with |E|, not N^2.

    # ---- zero-pad features / weights to lane-dense 128-wide slabs ----------
    def pad2(a, rows, cols, dtype):
        out = jnp.zeros((rows, cols), dtype)
        return out.at[: a.shape[0], : a.shape[1]].set(a.astype(dtype))

    x_p = pad2(x, n_pad, _LANE, jnp.bfloat16)
    w1 = pad2(params["w1"], _LANE, _LANE, jnp.bfloat16)
    w2 = pad2(params["w2"], _LANE, _LANE, jnp.bfloat16)
    b1 = pad2(params["b1"].reshape(1, -1), 1, _LANE, jnp.float32)
    b2 = pad2(params["b2"].reshape(1, -1), 1, _LANE, jnp.float32)

    kernel = functools.partial(_fused_gcn_kernel, tile=tile)

    cost = pl.CostEstimate(
        flops=int(4 * n_pad * n_pad * _LANE + 4 * n_pad * _LANE * _LANE),
        transcendentals=0,
        bytes_accessed=int(2 * n_pad * n_pad * 2      # A_hat (bf16) x 2 phases
                           + 2 * n_pad * _LANE * 2    # X + G
                           + n_pad * _LANE * 4        # output (f32)
                           + 4 * _LANE * _LANE * 2),  # weights/biases
    )

    out_pad = pl.pallas_call(
        kernel,
        out_shape=jax.ShapeDtypeStruct((n_pad, _LANE), jnp.float32),
        grid_spec=pltpu.PrefetchScalarGridSpec(
            num_scalar_prefetch=0,
            grid=(2, nk, nk),
            in_specs=[
                pl.BlockSpec((tile, tile), lambda p, i, k: (i, k)),    # A_hat
                pl.BlockSpec((tile, 1), lambda p, i, k: (i, 0)),       # dinv rows
                pl.BlockSpec((1, tile), lambda p, i, k: (0, k)),       # dinv cols
                pl.BlockSpec((tile, _LANE), lambda p, i, k: (k, 0)),   # X
                pl.BlockSpec((_LANE, _LANE), lambda p, i, k: (0, 0)),  # W1
                pl.BlockSpec((1, _LANE), lambda p, i, k: (0, 0)),      # b1
                pl.BlockSpec((_LANE, _LANE), lambda p, i, k: (0, 0)),  # W2
                pl.BlockSpec((1, _LANE), lambda p, i, k: (0, 0)),      # b2
            ],
            out_specs=pl.BlockSpec((tile, _LANE), lambda p, i, k: (i, 0)),
            scratch_shapes=[
                pltpu.VMEM((tile, _LANE), jnp.float32),    # f32 accumulator
                pltpu.VMEM((n_pad, _LANE), jnp.bfloat16),  # G = relu(.) @ W2
            ],
        ),
        compiler_params=pltpu.CompilerParams(
            # Phase 1 reads G produced across ALL row tiles of phase 0, so no
            # grid axis may be split across TensorCores -> all "arbitrary".
            dimension_semantics=("arbitrary", "arbitrary", "arbitrary"),
            vmem_limit_bytes=48 * 1024 * 1024,  # fits v7x's 64 MiB with headroom
        ),
        cost_estimate=cost,
    )(adj, dinv_row, dinv_col, x_p, w1, b1, w2, b2)

    return out_pad[:n, :out_ch]


# ----------------------------------------------------------------------------
# Pure-JAX f32 reference (for correctness check only)
# ----------------------------------------------------------------------------
def gcn_encoder_ref(x, edge_index, params):
    n = x.shape[0]
    src, dst = edge_index[0], edge_index[1]
    loop = jnp.arange(n, dtype=edge_index.dtype)
    src = jnp.concatenate([src, loop])
    dst = jnp.concatenate([dst, loop])
    adj = jnp.zeros((n, n), jnp.float32).at[dst, src].add(1.0)
    deg = jnp.sum(adj, axis=1)
    dinv = jnp.where(deg > 0, jax.lax.rsqrt(deg), 0.0)
    s = dinv[:, None] * adj * dinv[None, :]
    h = jnp.maximum(s @ (x @ params["w1"]) + params["b1"], 0.0)
    return s @ (h @ params["w2"]) + params["b2"]


def init_params(key, in_channels, hidden_channels, out_channels):
    k1, k2 = jax.random.split(key)

    def glorot(k, fan_in, fan_out):
        limit = jnp.sqrt(6.0 / (fan_in + fan_out))
        return jax.random.uniform(k, (fan_in, fan_out), jnp.float32, -limit, limit)

    return {
        "w1": glorot(k1, in_channels, hidden_channels),
        "b1": jnp.zeros((hidden_channels,), jnp.float32),
        "w2": glorot(k2, hidden_channels, out_channels),
        "b2": jnp.zeros((out_channels,), jnp.float32),
    }


if __name__ == "__main__":
    key = jax.random.PRNGKey(0)
    k_x, k_e, k_p = jax.random.split(key, 3)

    num_nodes = 16
    in_channels = 8
    hidden_channels = 32
    out_channels = 16
    num_edges = 40

    x = jax.random.normal(k_x, (num_nodes, in_channels), jnp.float32)
    edge_index = jax.random.randint(
        k_e, (2, num_edges), 0, num_nodes, dtype=jnp.int32
    )
    params = init_params(k_p, in_channels, hidden_channels, out_channels)

    out = jax.jit(gcn_encoder)(x, edge_index, params)
    out = jax.block_until_ready(out)

    assert out.shape == (num_nodes, out_channels)
    assert out.dtype == jnp.float32

    ref = gcn_encoder_ref(x, edge_index, params)
    max_err = float(jnp.max(jnp.abs(out - ref)))
    # bf16 operands with f32 accumulation: expect <~1e-2 abs error at O(1) scale.
    assert max_err < 1e-1, f"max abs err vs f32 reference: {max_err}"

    print("KERNEL_OK")
</pallas_src>

<mosaic_0001>
module attributes {stable_mosaic.version = 11 : i64} {
  func.func @_fused_gcn_kernel(%arg0: i32, %arg1: i32, %arg2: i32, %arg3: memref<128x128xbf16, #tpu.memory_space<vmem>>, %arg4: memref<128x1xf32, #tpu.memory_space<vmem>>, %arg5: memref<1x128xf32, #tpu.memory_space<vmem>>, %arg6: memref<128x128xbf16, #tpu.memory_space<vmem>>, %arg7: memref<128x128xbf16, #tpu.memory_space<vmem>>, %arg8: memref<1x128xf32, #tpu.memory_space<vmem>>, %arg9: memref<128x128xbf16, #tpu.memory_space<vmem>>, %arg10: memref<1x128xf32, #tpu.memory_space<vmem>>, %arg11: memref<128x128xf32, #tpu.memory_space<vmem>>, %arg12: memref<128x128xf32, #tpu.memory_space<vmem>>, %arg13: memref<128x128xbf16, #tpu.memory_space<vmem>>) attributes {dimension_semantics = [#tpu.dimension_semantics<arbitrary>, #tpu.dimension_semantics<arbitrary>, #tpu.dimension_semantics<arbitrary>], iteration_bounds = array<i64: 2, 1, 1>, scalar_prefetch = 0 : i64, scratch_operands = 2 : i64, tpu.core_type = #tpu.core_type<tc>, window_params = [{transform_indices = @transform_0, window_bounds = array<i64: 128, 128>}, {transform_indices = @transform_1, window_bounds = array<i64: 128, 1>}, {transform_indices = @transform_2, window_bounds = array<i64: 1, 128>}, {transform_indices = @transform_3, window_bounds = array<i64: 128, 128>}, {pipeline_mode = #tpu.pipeline_mode<synchronous>, transform_indices = @transform_4, window_bounds = array<i64: 128, 128>}, {pipeline_mode = #tpu.pipeline_mode<synchronous>, transform_indices = @transform_5, window_bounds = array<i64: 1, 128>}, {pipeline_mode = #tpu.pipeline_mode<synchronous>, transform_indices = @transform_6, window_bounds = array<i64: 128, 128>}, {pipeline_mode = #tpu.pipeline_mode<synchronous>, transform_indices = @transform_7, window_bounds = array<i64: 1, 128>}, {transform_indices = @transform_8, window_bounds = array<i64: 128, 128>}]} {
    %c0_i32 = arith.constant 0 : i32
    %0 = arith.cmpi eq, %arg2, %c0_i32 : i32
    %1 = arith.extui %0 : i1 to i32
    %c0_i32_0 = arith.constant 0 : i32
    %2 = arith.cmpi ne, %1, %c0_i32_0 : i32
    scf.if %2 {
      %cst = arith.constant 0.000000e+00 : f32
      %18 = vector.broadcast %cst : f32 to vector<128x128xf32>
      %c0_9 = arith.constant 0 : index
      %c0_10 = arith.constant 0 : index
      %19 = vector.load %arg12[%c0_9, %c0_10] : memref<128x128xf32, #tpu.memory_space<vmem>>, vector<128x128xf32>
      tpu.vector_store %arg12[%c0_9, %c0_10], %18 {strides = array<i32>} : memref<128x128xf32, #tpu.memory_space<vmem>>, vector<128x128xf32>,
    } else {
    }
    %c0 = arith.constant 0 : index
    %c0_1 = arith.constant 0 : index
    %3 = vector.load %arg3[%c0, %c0_1] : memref<128x128xbf16, #tpu.memory_space<vmem>>, vector<128x128xbf16>
    %4 = arith.extf %3 : vector<128x128xbf16> to vector<128x128xf32>
    %c0_2 = arith.constant 0 : index
    %c0_3 = arith.constant 0 : index
    %5 = vector.load %arg4[%c0_2, %c0_3] : memref<128x1xf32, #tpu.memory_space<vmem>>, vector<128x1xf32>
    %6 = vector.broadcast %5 : vector<128x1xf32> to vector<128x128xf32>
    %7 = arith.mulf %4, %6 : vector<128x128xf32>
    %c0_4 = arith.constant 0 : index
    %c0_5 = arith.constant 0 : index
    %8 = vector.load %arg5[%c0_4, %c0_5] : memref<1x128xf32, #tpu.memory_space<vmem>>, vector<1x128xf32>
    %9 = vector.broadcast %8 : vector<1x128xf32> to vector<128x128xf32>
    %10 = arith.mulf %7, %9 : vector<128x128xf32>
    %11 = arith.truncf %10 : vector<128x128xf32> to vector<128x128xbf16>
    %c0_i32_6 = arith.constant 0 : i32
    %12 = arith.cmpi eq, %arg0, %c0_i32_6 : i32
    %13 = arith.extui %12 : i1 to i32
    %c0_i32_7 = arith.constant 0 : i32
    %14 = arith.cmpi ne, %13, %c0_i32_7 : i32
    scf.if %14 {
      %c0_9 = arith.constant 0 : index
      %c0_10 = arith.constant 0 : index
      %18 = vector.load %arg12[%c0_9, %c0_10] : memref<128x128xf32, #tpu.memory_space<vmem>>, vector<128x128xf32>
      %c0_11 = arith.constant 0 : index
      %c0_12 = arith.constant 0 : index
      %19 = vector.load %arg6[%c0_11, %c0_12] : memref<128x128xbf16, #tpu.memory_space<vmem>>, vector<128x128xbf16>
      %cst = arith.constant dense<0.000000e+00> : vector<128x128xf32>
      %20 = tpu.matmul %11, %19, %cst {dimension_numbers = #tpu.dot_dimension_numbers<[1], [0], [0], [1], [0, 0, 1, 1], [], []>} : vector<128x128xbf16>, vector<128x128xbf16>, vector<128x128xf32> -> vector<128x128xf32>
      %21 = arith.addf %18, %20 : vector<128x128xf32>
      %c0_13 = arith.constant 0 : index
      %c0_14 = arith.constant 0 : index
      %22 = vector.load %arg12[%c0_13, %c0_14] : memref<128x128xf32, #tpu.memory_space<vmem>>, vector<128x128xf32>
      tpu.vector_store %arg12[%c0_13, %c0_14], %21 {strides = array<i32>} : memref<128x128xf32, #tpu.memory_space<vmem>>, vector<128x128xf32>,
      %c0_i32_15 = arith.constant 0 : i32
      %23 = arith.cmpi eq, %arg2, %c0_i32_15 : i32
      %24 = arith.extui %23 : i1 to i32
      %c0_i32_16 = arith.constant 0 : i32
      %25 = arith.cmpi ne, %24, %c0_i32_16 : i32
      scf.if %25 {
        %c0_17 = arith.constant 0 : index
        %c0_18 = arith.constant 0 : index
        %26 = vector.load %arg12[%c0_17, %c0_18] : memref<128x128xf32, #tpu.memory_space<vmem>>, vector<128x128xf32>
        %27 = arith.truncf %26 : vector<128x128xf32> to vector<128x128xbf16>
        %c0_19 = arith.constant 0 : index
        %c0_20 = arith.constant 0 : index
        %28 = vector.load %arg7[%c0_19, %c0_20] : memref<128x128xbf16, #tpu.memory_space<vmem>>, vector<128x128xbf16>
        %cst_21 = arith.constant dense<0.000000e+00> : vector<128x128xf32>
        %29 = tpu.matmul %27, %28, %cst_21 {dimension_numbers = #tpu.dot_dimension_numbers<[1], [0], [0], [1], [0, 0, 1, 1], [], []>} : vector<128x128xbf16>, vector<128x128xbf16>, vector<128x128xf32> -> vector<128x128xf32>
        %c0_22 = arith.constant 0 : index
        %c0_23 = arith.constant 0 : index
        %30 = vector.load %arg8[%c0_22, %c0_23] : memref<1x128xf32, #tpu.memory_space<vmem>>, vector<1x128xf32>
        %31 = vector.broadcast %30 : vector<1x128xf32> to vector<128x128xf32>
        %32 = arith.addf %29, %31 : vector<128x128xf32>
        %cst_24 = arith.constant 0.000000e+00 : f32
        %33 = vector.broadcast %cst_24 : f32 to vector<128x128xf32>
        %34 = arith.maximumf %32, %33 : vector<128x128xf32>
        %35 = arith.truncf %34 : vector<128x128xf32> to vector<128x128xbf16>
        %c0_25 = arith.constant 0 : index
        %c0_26 = arith.constant 0 : index
        %36 = vector.load %arg9[%c0_25, %c0_26] : memref<128x128xbf16, #tpu.memory_space<vmem>>, vector<128x128xbf16>
        %cst_27 = arith.constant dense<0.000000e+00> : vector<128x128xf32>
        %37 = tpu.matmul %35, %36, %cst_27 {dimension_numbers = #tpu.dot_dimension_numbers<[1], [0], [0], [1], [0, 0, 1, 1], [], []>} : vector<128x128xbf16>, vector<128x128xbf16>, vector<128x128xf32> -> vector<128x128xf32>
        %c128_i32 = arith.constant 128 : i32
        %38 = arith.muli %arg1, %c128_i32 : i32
        %39 = tpu.assume_multiple %38, 128 : i32
        %40 = arith.truncf %37 : vector<128x128xf32> to vector<128x128xbf16>
        %41 = arith.index_cast %39 : i32 to index
        %c0_28 = arith.constant 0 : index
        %42 = vector.load %arg13[%41, %c0_28] : memref<128x128xbf16, #tpu.memory_space<vmem>>, vector<128x128xbf16>
        tpu.vector_store %arg13[%41, %c0_28], %40 {strides = array<i32>} : memref<128x128xbf16, #tpu.memory_space<vmem>>, vector<128x128xbf16>,
        %c0_29 = arith.constant 0 : index
        %c0_30 = arith.constant 0 : index
        %43 = vector.load %arg11[%c0_29, %c0_30] : memref<128x128xf32, #tpu.memory_space<vmem>>, vector<128x128xf32>
        tpu.vector_store %arg11[%c0_29, %c0_30], %37 {strides = array<i32>} : memref<128x128xf32, #tpu.memory_space<vmem>>, vector<128x128xf32>,
      } else {
      }
    } else {
    }
    %c1_i32 = arith.constant 1 : i32
    %15 = arith.cmpi eq, %arg0, %c1_i32 : i32
    %16 = arith.extui %15 : i1 to i32
    %c0_i32_8 = arith.constant 0 : i32
    %17 = arith.cmpi ne, %16, %c0_i32_8 : i32
    scf.if %17 {
      %c128_i32 = arith.constant 128 : i32
      %18 = arith.muli %arg2, %c128_i32 : i32
      %19 = tpu.assume_multiple %18, 128 : i32
      %c0_9 = arith.constant 0 : index
      %c0_10 = arith.constant 0 : index
      %20 = vector.load %arg12[%c0_9, %c0_10] : memref<128x128xf32, #tpu.memory_space<vmem>>, vector<128x128xf32>
      %21 = arith.index_cast %19 : i32 to index
      %c0_11 = arith.constant 0 : index
      %22 = vector.load %arg13[%21, %c0_11] : memref<128x128xbf16, #tpu.memory_space<vmem>>, vector<128x128xbf16>
      %cst = arith.constant dense<0.000000e+00> : vector<128x128xf32>
      %23 = tpu.matmul %11, %22, %cst {dimension_numbers = #tpu.dot_dimension_numbers<[1], [0], [0], [1], [0, 0, 1, 1], [], []>} : vector<128x128xbf16>, vector<128x128xbf16>, vector<128x128xf32> -> vector<128x128xf32>
      %24 = arith.addf %20, %23 : vector<128x128xf32>
      %c0_12 = arith.constant 0 : index
      %c0_13 = arith.constant 0 : index
      %25 = vector.load %arg12[%c0_12, %c0_13] : memref<128x128xf32, #tpu.memory_space<vmem>>, vector<128x128xf32>
      tpu.vector_store %arg12[%c0_12, %c0_13], %24 {strides = array<i32>} : memref<128x128xf32, #tpu.memory_space<vmem>>, vector<128x128xf32>,
      %c0_i32_14 = arith.constant 0 : i32
      %26 = arith.cmpi eq, %arg2, %c0_i32_14 : i32
      %27 = arith.extui %26 : i1 to i32
      %c0_i32_15 = arith.constant 0 : i32
      %28 = arith.cmpi ne, %27, %c0_i32_15 : i32
      scf.if %28 {
        %c0_16 = arith.constant 0 : index
        %c0_17 = arith.constant 0 : index
        %29 = vector.load %arg12[%c0_16, %c0_17] : memref<128x128xf32, #tpu.memory_space<vmem>>, vector<128x128xf32>
        %c0_18 = arith.constant 0 : index
        %c0_19 = arith.constant 0 : index
        %30 = vector.load %arg10[%c0_18, %c0_19] : memref<1x128xf32, #tpu.memory_space<vmem>>, vector<1x128xf32>
        %31 = vector.broadcast %30 : vector<1x128xf32> to vector<128x128xf32>
        %32 = arith.addf %29, %31 : vector<128x128xf32>
        %c0_20 = arith.constant 0 : index
        %c0_21 = arith.constant 0 : index
        %33 = vector.load %arg11[%c0_20, %c0_21] : memref<128x128xf32, #tpu.memory_space<vmem>>, vector<128x128xf32>
        tpu.vector_store %arg11[%c0_20, %c0_21], %32 {strides = array<i32>} : memref<128x128xf32, #tpu.memory_space<vmem>>, vector<128x128xf32>,
      } else {
      }
    } else {
    }
    return
  }
  func.func @transform_0(%arg0: i32, %arg1: i32, %arg2: i32) -> (i32, i32) {
    %c0_i32 = arith.constant 0 : i32
    return %arg1, %arg2 : i32, i32
  }
  func.func @transform_1(%arg0: i32, %arg1: i32, %arg2: i32) -> (i32, i32) {
    %c0_i32 = arith.constant 0 : i32
    %c0_i32_0 = arith.constant 0 : i32
    return %arg1, %c0_i32 : i32, i32
  }
  func.func @transform_2(%arg0: i32, %arg1: i32, %arg2: i32) -> (i32, i32) {
    %c0_i32 = arith.constant 0 : i32
    %c0_i32_0 = arith.constant 0 : i32
    return %c0_i32, %arg2 : i32, i32
  }
  func.func @transform_3(%arg0: i32, %arg1: i32, %arg2: i32) -> (i32, i32) {
    %c0_i32 = arith.constant 0 : i32
    %c0_i32_0 = arith.constant 0 : i32
    return %arg2, %c0_i32 : i32, i32
  }
  func.func @transform_4(%arg0: i32, %arg1: i32, %arg2: i32) -> (i32, i32) {
    %c0_i32 = arith.constant 0 : i32
    %c0_i32_0 = arith.constant 0 : i32
    %c0_i32_1 = arith.constant 0 : i32
    return %c0_i32, %c0_i32_0 : i32, i32
  }
  func.func @transform_5(%arg0: i32, %arg1: i32, %arg2: i32) -> (i32, i32) {
    %c0_i32 = arith.constant 0 : i32
    %c0_i32_0 = arith.constant 0 : i32
    %c0_i32_1 = arith.constant 0 : i32
    return %c0_i32, %c0_i32_0 : i32, i32
  }
  func.func @transform_6(%arg0: i32, %arg1: i32, %arg2: i32) -> (i32, i32) {
    %c0_i32 = arith.constant 0 : i32
    %c0_i32_0 = arith.constant 0 : i32
    %c0_i32_1 = arith.constant 0 : i32
    return %c0_i32, %c0_i32_0 : i32, i32
  }
  func.func @transform_7(%arg0: i32, %arg1: i32, %arg2: i32) -> (i32, i32) {
    %c0_i32 = arith.constant 0 : i32
    %c0_i32_0 = arith.constant 0 : i32
    %c0_i32_1 = arith.constant 0 : i32
    return %c0_i32, %c0_i32_0 : i32, i32
  }
  func.func @transform_8(%arg0: i32, %arg1: i32, %arg2: i32) -> (i32, i32) {
    %c0_i32 = arith.constant 0 : i32
    %c0_i32_0 = arith.constant 0 : i32
    return %arg1, %c0_i32 : i32, i32
  }
}

</mosaic_0001>

<bundles_post_ra>
// kernel: gcn_encoder.1
= control target key start
LH: loop header
LB: loop body
LE: loop exit
PB: predicated region body
PF: predicated region fallthrough
CT: control target
= control target key end

     0   :  { %s1986_s27 = smov 0   ;;  %s1988_s28 = smov 0   ;;  %s2358_s0 = inlined_call_operand.vmem [shape: bf16[128,128], index: 0, kind: input, shape index: {}]   ;;  %s2359_s1 = inlined_call_operand.vmem [shape: f32[128,1], index: 1, kind: input, shape index: {}]   ;;  %s2360_s2 = inlined_call_operand.vmem [shape: f32[1,128], index: 2, kind: input, shape index: {}]   ;;  %s2361_s3 = inlined_call_operand.vmem [shape: bf16[128,128], index: 3, kind: input, shape index: {}]   ;;  %s2362_s4 = inlined_call_operand.vmem [shape: bf16[128,128], index: 4, kind: input, shape index: {}]   ;;  %s2363_s5 = inlined_call_operand.vmem [shape: f32[1,128], index: 5, kind: input, shape index: {}]   ;;  %s2364_s6 = inlined_call_operand.vmem [shape: bf16[128,128], index: 6, kind: input, shape index: {}]   ;;  %s2365_s7 = inlined_call_operand.vmem [shape: f32[1,128], index: 7, kind: input, shape index: {}]   ;;  %s2366_s8 = inlined_call_operand.vmem [shape: f32[128,128], index: 8, kind: output, shape index: {}]  }
   0x1   :  { %s1990_s29 = smov 0  }
   0x2 LB: > { %s37_s30 = sadd.s32 1, %s1933_s28  ;;  %p1566_p0 = scmp.ge.s32.totalorder %s1937_s29, 1  ;;  %s1937_s29 = sphi %s1990_s29, %s18_s29   ;;  %s1933_s28 = sphi %s1988_s28, %s2368_s28   ;;  %s1929_s27 = sphi %s1986_s27, %s2367_s27  }
   0x3   : > { %p39_p1 = scmp.ge.s32.totalorder %s37_s30, 2  ;;  %p317_p2 = scmp.lt.s32.totalorder %s1937_s29, 3 }
   0x5   : > { %s2370_s30 = smov (%p39_p1, %s37_s30), 0  ;;  %p318_p3 = pnand %p1566_p0, %p317_p2 }
   0x6   : > { %v452_v0 = vld [vmem:[%s2359_s1 + $0x10] sm:$0xff] (!%p318_p3)  ;;  %v450_v1 = vld [vmem:[%s2359_s1] sm:$0xff] (!%p318_p3)  ;;  %v1939_v2 = vmov (!%p318_p3), 0   ;;  %v453_v3 = vld [vmem:[%s2359_s1 + $0x18] sm:$0xff] (!%p318_p3)  ;;  %v1940_v17 = vmov (!%p318_p3), 0.0   ;;  %p1568_p4 = scmp.ne.s32.totalorder (!%p318_p3), %s1929_s27, 0 }
   0x7   : > { %321 = sbr.rel (%p318_p3) target bundleno = 1139 (0x473), region = 52  ;;  %1890 = vset.pattern.permute.xlu1 (!%p318_p3), %v1939_v2  ;;  %1889 = vset.pattern.permute.xlu0 (!%p318_p3), %v1939_v2  ;;  %v451_v4 = vld [vmem:[%s2359_s1 + $0x8] sm:$0xff] (!%p318_p3)  ;;  %v454_v6 = vld [vmem:[%s2359_s1 + $0x20] sm:$0xff] (!%p318_p3)  ;;  %v457_v7 = vld [vmem:[%s2359_s1 + $0x38] sm:$0xff] (!%p318_p3)  ;;  %402 = vst [vmem:[#allocation2] sm:$0xff] (!%p318_p3), %v1940_v17 }
   0x8   : > { %478 = vperm.xlu1 (!%p318_p3), %1890, %v452_v0   ;;  %468 = vperm.xlu0 (!%p318_p3), %1889, %v450_v1   ;;  %v455_v5 = vld [vmem:[%s2359_s1 + $0x28] sm:$0xff] (!%p318_p3)  ;;  %v456_v8 = vld [vmem:[%s2359_s1 + $0x30] sm:$0xff] (!%p318_p3)  ;;  %v458_v10 = vld [vmem:[%s2359_s1 + $0x40] sm:$0xff] (!%p318_p3)  ;;  %403 = vst [vmem:[#allocation2 + $0x8] sm:$0xff] (!%p318_p3), %v1940_v17 }
   0x9   : > { %v459_v9 = vld [vmem:[%s2359_s1 + $0x48] sm:$0xff] (!%p318_p3)  ;;  %v461_v11 = vld [vmem:[%s2359_s1 + $0x58] sm:$0xff] (!%p318_p3)  ;;  %v460_v12 = vld [vmem:[%s2359_s1 + $0x50] sm:$0xff] (!%p318_p3)  ;;  %404 = vst [vmem:[#allocation2 + $0x10] sm:$0xff] (!%p318_p3), %v1940_v17 }
   0xa   : > { %v463_v13 = vld [vmem:[%s2359_s1 + $0x68] sm:$0xff] (!%p318_p3)  ;;  %v462_v14 = vld [vmem:[%s2359_s1 + $0x60] sm:$0xff] (!%p318_p3)  ;;  %v465_v15 = vld [vmem:[%s2359_s1 + $0x78] sm:$0xff] (!%p318_p3)  ;;  %405 = vst [vmem:[#allocation2 + $0x18] sm:$0xff] (!%p318_p3), %v1940_v17 }
   0xb   : > { %v464_v16 = vld [vmem:[%s2359_s1 + $0x70] sm:$0xff] (!%p318_p3)  ;;  %406 = vst [vmem:[#allocation2 + $0x20] sm:$0xff] (!%p318_p3), %v1940_v17  ;;  %407 = vst [vmem:[#allocation2 + $0x28] sm:$0xff] (!%p318_p3), %v1940_v17  ;;  %v1632_v18 = vld [vmem:[%s2358_s0 + $0x8] sm:$0xff] (!%p318_p3)  }
   0xc   : > { %483 = vperm.xlu1 (!%p318_p3), %1890, %v453_v3   ;;  %473 = vperm.xlu0 (!%p318_p3), %1889, %v451_v4   ;;  %408 = vst [vmem:[#allocation2 + $0x30] sm:$0xff] (!%p318_p3), %v1940_v17  ;;  %409 = vst [vmem:[#allocation2 + $0x38] sm:$0xff] (!%p318_p3), %v1940_v17  ;;  %v1601_v19 = vld [vmem:[%s2358_s0] sm:$0xff] (!%p318_p3)   ;;  %v1606_v20 = vunpack.c.l.bf16 (!%p318_p3), %v1632_v18  ;;  %v1607_v24 = vunpack.c.h.bf16 (!%p318_p3), %v1632_v18  ;;  %v1633_v26 = vld [vmem:[%s2358_s0 + $0x10] sm:$0xff] (!%p318_p3)  }
   0xd   : > { %410 = vst [vmem:[#allocation2 + $0x40] sm:$0xff] (!%p318_p3), %v1940_v17  ;;  %411 = vst [vmem:[#allocation2 + $0x48] sm:$0xff] (!%p318_p3), %v1940_v17  ;;  %v1602_v21 = vunpack.c.l.bf16 (!%p318_p3), %v1601_v19  ;;  %v1603_v25 = vunpack.c.h.bf16 (!%p318_p3), %v1601_v19  ;;  %v2066_v29 = vld [vmem:[%s2360_s2] ss:$0 sm:$0xff] (!%p318_p3)  ;;  %v1611_v34 = vunpack.c.h.bf16 (!%p318_p3), %v1633_v26  ;;  %v1610_v35 = vunpack.c.l.bf16 (!%p318_p3), %v1633_v26  ;;  %v1634_v36 = vld [vmem:[%s2358_s0 + $0x18] sm:$0xff] (!%p318_p3)  }
   0xe   : > { %412 = vst [vmem:[#allocation2 + $0x50] sm:$0xff] %v1940_v17  ;;  %413 = vst [vmem:[#allocation2 + $0x58] sm:$0xff] %v1940_v17  ;;  %v1615_v43 = vunpack.c.h.bf16 %v1634_v36  ;;  %v1614_v44 = vunpack.c.l.bf16 %v1634_v36  ;;  %v1635_v49 = vld [vmem:[%s2358_s0 + $0x20] sm:$0xff]   ;;  %v1636_v59 = vld [vmem:[%s2358_s0 + $0x28] sm:$0xff]  }
   0xf   : > { %414 = vst [vmem:[#allocation2 + $0x60] sm:$0xff] %v1940_v17  ;;  %415 = vst [vmem:[#allocation2 + $0x68] sm:$0xff] %v1940_v17  ;;  %v1619_v54 = vunpack.c.h.bf16 %v1635_v49  ;;  %v1618_v58 = vunpack.c.l.bf16 %v1635_v49  ;;  %v1623_v0 = vunpack.c.h.bf16 %v1636_v59  ;;  %v1622_v4 = vunpack.c.l.bf16 %v1636_v59  ;;  %v1891_v36 = vld [vmem:[%s2361_s3] sm:$0xff] (!%p1568_p4)   ;;  %v2201_v59 = vld [vmem:[%s2364_s6 + $0x28] sm:$0xff] (!%p1568_p4)  }
  0x10   : > { %493 = vperm.xlu1 %1890, %v455_v5   ;;  %488 = vperm.xlu0 %1889, %v454_v6   ;;  %416 = vst [vmem:[#allocation2 + $0x70] sm:$0xff] %v1940_v17  ;;  %417 = vst [vmem:[#allocation2 + $0x78] sm:$0xff] %v1940_v17  ;;  %v1637_v5 = vld [vmem:[%s2358_s0 + $0x30] sm:$0xff]   ;;  %v1903_v49 = vld [vmem:[%s2362_s4 + $0x20] sm:$0xff] (!%p1568_p4)  }
  0x11   : > { %1703 = vmatprep.subr.bf16.mxu0 (!%p1568_p4), %v1891_v36 }
  0x12   : > { %1704 = vmatpush3.bf16.msra.mxu0 (!%p1568_p4), %v1891_v36 }
  0x14   : > { %503 = vperm.xlu1 %1890, %v457_v7   ;;  %498 = vperm.xlu0 %1889, %v456_v8   ;;  %v606_v36 = vld [vmem:[#allocation2 + $0x48] sm:$0xff] (!%p1568_p4) }
  0x18   : > { %513 = vperm.xlu1 %1890, %v459_v9   ;;  %508 = vperm.xlu0 %1889, %v458_v10   ;;  %v1627_v10 = vunpack.c.h.bf16 %v1637_v5 }
  0x1c   : > { %523 = vperm.xlu1 %1890, %v461_v11   ;;  %518 = vperm.xlu0 %1889, %v460_v12  }
  0x20   : > { %533 = vperm.xlu1 %1890, %v463_v13   ;;  %528 = vperm.xlu0 %1889, %v462_v14   ;;  %v1626_v14 = vunpack.c.l.bf16 %v1637_v5 }
  0x24   : > { %543 = vperm.xlu1 %1890, %v465_v15   ;;  %538 = vperm.xlu0 %1889, %v464_v16   ;;  %v1638_v15 = vld [vmem:[%s2358_s0 + $0x38] sm:$0xff]  }
  0x87   : > { %v479_v22 = vpop.permute.xlu1 %478  ;;  %v469_v23 = vpop.permute.xlu0 %468 }
  0x88   : > { %v548_v27 = vmul.f32 %v1606_v20, %v479_v22  ;;  %v546_v28 = vmul.f32 %v1602_v21, %v469_v23  ;;  %v1631_v20 = vunpack.c.h.bf16 %v1638_v15 }
  0x8a   : > { %v571_v37 = vmul.f32 %v2066_v29, %v548_v27  ;;  %v569_v38 = vmul.f32 %v2066_v29, %v546_v28 }
  0x8b   : > { %v484_v30 = vpop.permute.xlu1 %483  ;;  %v474_v31 = vpop.permute.xlu0 %473 }
  0x8c   : > { %v549_v32 = vmul.f32 %v1607_v24, %v484_v30  ;;  %v547_v33 = vmul.f32 %v1603_v25, %v474_v31  ;;  %v1630_v24 = vunpack.c.l.bf16 %v1638_v15  ;;  %v604_v15 = vld [vmem:[#allocation2 + $0x38] sm:$0xff] (!%p1568_p4) }
  0x8e   : > { %v572_v39 = vmul.f32 %v2066_v29, %v549_v32  ;;  %v570_v40 = vmul.f32 %v2066_v29, %v547_v33 }
  0x8f   : > { %v494_v41 = vpop.permute.xlu1 %493  ;;  %v489_v42 = vpop.permute.xlu0 %488 }
  0x90   : > { %v2075_v45 = vpack.c.bf16 %v572_v39, %v571_v37  ;;  %v2077_v46 = vpack.c.bf16 %v570_v40, %v569_v38  ;;  %v551_v47 = vmul.f32 %v1611_v34, %v494_v41  ;;  %v550_v48 = vmul.f32 %v1610_v35, %v489_v42  ;;  %v1892_v37 = vld [vmem:[%s2361_s3 + $0x8] sm:$0xff] (!%p1568_p4)   ;;  %v1894_v38 = vld [vmem:[%s2361_s3 + $0x18] sm:$0xff] (!%p1568_p4)   ;;  %v1899_v39 = vld [vmem:[%s2362_s4] sm:$0xff] (!%p1568_p4)  }
  0x91   : > { %1705 = vmatprep.subr.bf16.mxu0 (!%p1568_p4), %v1892_v37  ;;  %v1900_v40 = vld [vmem:[%s2362_s4 + $0x8] sm:$0xff] (!%p1568_p4)   ;;  %1735 = vmatprep.subr.bf16.mxu1 (!%p1568_p4), %v1899_v39  ;;  %v1895_v41 = vld [vmem:[%s2361_s3 + $0x20] sm:$0xff] (!%p1568_p4)   ;;  %v1901_v42 = vld [vmem:[%s2362_s4 + $0x10] sm:$0xff] (!%p1568_p4)  }
  0x92   : > { %v574_v50 = vmul.f32 %v2066_v29, %v551_v47  ;;  %v573_v51 = vmul.f32 %v2066_v29, %v550_v48  ;;  %1719 = vmatprep.mubr.bf16.mxu0 (!%p1568_p4), %v2077_v46  ;;  %1706 = vmatpush3.bf16.msra.mxu0 (!%p1568_p4), %v1892_v37  ;;  %v1897_v47 = vld [vmem:[%s2361_s3 + $0x30] sm:$0xff] (!%p1568_p4)   ;;  %v1898_v48 = vld [vmem:[%s2361_s3 + $0x38] sm:$0xff] (!%p1568_p4)  }
  0x93   : > { %v504_v52 = vpop.permute.xlu1 %503  ;;  %v499_v53 = vpop.permute.xlu0 %498  ;;  %1736 = vmatpush3.bf16.msra.mxu1 (!%p1568_p4), %v1899_v39 }
  0x94   : > { %v2084_v55 = vpack.c.bf16 %v574_v50, %v573_v51  ;;  %v553_v56 = vmul.f32 %v1615_v43, %v504_v52  ;;  %v552_v57 = vmul.f32 %v1614_v44, %v499_v53  ;;  %1737 = vmatprep.subr.bf16.mxu1 (!%p1568_p4), %v1900_v40  ;;  %v1896_v43 = vld [vmem:[%s2361_s3 + $0x28] sm:$0xff] (!%p1568_p4)   ;;  %v1902_v44 = vld [vmem:[%s2362_s4 + $0x18] sm:$0xff] (!%p1568_p4)   ;;  %v1905_v51 = vld [vmem:[%s2362_s4 + $0x30] sm:$0xff] (!%p1568_p4)  }
  0x95   : > { %v1904_v50 = vld [vmem:[%s2362_s4 + $0x28] sm:$0xff] (!%p1568_p4)   ;;  %v1906_v52 = vld [vmem:[%s2362_s4 + $0x38] sm:$0xff] (!%p1568_p4)   ;;  %v1907_v53 = vld [vmem:[%s2364_s6] sm:$0xff] (!%p1568_p4)  }
  0x96   : > { %v576_v60 = vmul.f32 %v2066_v29, %v553_v56  ;;  %v575_v61 = vmul.f32 %v2066_v29, %v552_v57  ;;  %v2181_v56 = vld [vmem:[%s2364_s6 + $0x10] sm:$0xff] (!%p1568_p4)   ;;  %v2187_v57 = vld [vmem:[%s2364_s6 + $0x18] sm:$0xff] (!%p1568_p4)  }
  0x97   : > { %v514_v62 = vpop.permute.xlu1 %513  ;;  %v509_v63 = vpop.permute.xlu0 %508  ;;  %1738 = vmatpush3.bf16.msra.mxu1 (!%p1568_p4), %v1900_v40 }
  0x98   : > { %v2091_v1 = vpack.c.bf16 %v576_v60, %v575_v61  ;;  %v555_v2 = vmul.f32 %v1619_v54, %v514_v62  ;;  %v554_v3 = vmul.f32 %v1618_v58, %v509_v63  ;;  %1739 = vmatprep.subr.bf16.mxu1 (!%p1568_p4), %v1901_v42  ;;  %v1908_v54 = vld [vmem:[%s2364_s6 + $0x8] sm:$0xff] (!%p1568_p4)   ;;  %v2194_v58 = vld [vmem:[%s2364_s6 + $0x20] sm:$0xff] (!%p1568_p4)   ;;  %v599_v60 = vld [vmem:[#allocation2 + $0x10] sm:$0xff] (!%p1568_p4) }
  0x99   : > { %v597_v61 = vld [vmem:[#allocation2] sm:$0xff] (!%p1568_p4)  ;;  %v600_v63 = vld [vmem:[#allocation2 + $0x18] sm:$0xff] (!%p1568_p4) }
  0x9a   : > { %v578_v6 = vmul.f32 %v2066_v29, %v555_v2  ;;  %v577_v7 = vmul.f32 %v2066_v29, %v554_v3  ;;  %v598_v3 = vld [vmem:[#allocation2 + $0x8] sm:$0xff] (!%p1568_p4) }
  0x9b   : > { %v524_v8 = vpop.permute.xlu1 %523  ;;  %v519_v9 = vpop.permute.xlu0 %518  ;;  %1740 = vmatpush3.bf16.msra.mxu1 (!%p1568_p4), %v1901_v42  ;;  %v611_v42 = vld [vmem:[#allocation2 + $0x70] sm:$0xff] (!%p1568_p4) }
  0x9c   : > { %v2098_v11 = vpack.c.bf16 %v578_v6, %v577_v7  ;;  %v557_v12 = vmul.f32 %v1623_v0, %v524_v8  ;;  %v556_v13 = vmul.f32 %v1622_v4, %v519_v9  ;;  %1741 = vmatprep.subr.bf16.mxu1 (!%p1568_p4), %v1902_v44 }
  0x9e   : > { %v580_v16 = vmul.f32 %v2066_v29, %v557_v12  ;;  %v579_v17 = vmul.f32 %v2066_v29, %v556_v13  ;;  %v601_v13 = vld [vmem:[#allocation2 + $0x20] sm:$0xff] (!%p1568_p4) }
  0x9f   : > { %v534_v18 = vpop.permute.xlu1 %533  ;;  %v529_v19 = vpop.permute.xlu0 %528  ;;  %1742 = vmatpush3.bf16.msra.mxu1 (!%p1568_p4), %v1902_v44  ;;  %v609_v44 = vld [vmem:[#allocation2 + $0x60] sm:$0xff] (!%p1568_p4) }
  0xa0   : > { %v2105_v21 = vpack.c.bf16 %v580_v16, %v579_v17  ;;  %v559_v22 = vmul.f32 %v1627_v10, %v534_v18  ;;  %v558_v23 = vmul.f32 %v1626_v14, %v529_v19  ;;  %1743 = vmatprep.subr.bf16.mxu1 (!%p1568_p4), %v1903_v49  ;;  %v603_v10 = vld [vmem:[#allocation2 + $0x30] sm:$0xff] (!%p1568_p4)  ;;  %v602_v18 = vld [vmem:[#allocation2 + $0x28] sm:$0xff] (!%p1568_p4) }
  0xa2   : > { %v582_v25 = vmul.f32 %v2066_v29, %v559_v22  ;;  %v581_v26 = vmul.f32 %v2066_v29, %v558_v23  ;;  %596 = sbr.rel (%p1568_p4) target bundleno = 875 (0x36b), region = 60 }
  0xa3   : > { %v544_v27 = vpop.permute.xlu1 %543  ;;  %v539_v28 = vpop.permute.xlu0 %538  ;;  %1744 = vmatpush3.bf16.msra.mxu1 (!%p1568_p4), %v1903_v49 }
  0xa4   : > { %v2109_v30 = vpack.c.bf16 %v582_v25, %v581_v26  ;;  %v561_v31 = vmul.f32 %v1631_v20, %v544_v27  ;;  %v560_v32 = vmul.f32 %v1630_v24, %v539_v28  ;;  %1745 = vmatprep.subr.bf16.mxu1 (!%p1568_p4), %v1904_v50  ;;  %v607_v26 = vld [vmem:[#allocation2 + $0x50] sm:$0xff] (!%p1568_p4)  ;;  %v605_v28 = vld [vmem:[#allocation2 + $0x40] sm:$0xff] (!%p1568_p4) }
  0xa6   : > { %v584_v33 = vmul.f32 %v2066_v29, %v561_v31  ;;  %v583_v34 = vmul.f32 %v2066_v29, %v560_v32  ;;  %v1893_v29 = vld [vmem:[%s2361_s3 + $0x10] sm:$0xff] (!%p1568_p4)   ;;  %v608_v32 = vld [vmem:[#allocation2 + $0x58] sm:$0xff] (!%p1568_p4) }
  0xa7   : > { %1707 = vmatprep.subr.bf16.mxu0 (!%p1568_p4), %v1893_v29  ;;  %1746 = vmatpush3.bf16.msra.mxu1 (!%p1568_p4), %v1904_v50 }
  0xa8   : > { %v2113_v35 = vpack.c.bf16 %v584_v33, %v583_v34  ;;  %1708 = vmatpush3.bf16.msra.mxu0 (!%p1568_p4), %v1893_v29  ;;  %1747 = vmatprep.subr.bf16.mxu1 (!%p1568_p4), %v1905_v51 }
  0xa9   : > { %1709 = vmatprep.subr.bf16.mxu0 %v1894_v38 }
  0xab   : > { %1748 = vmatpush3.bf16.msra.mxu1 %v1905_v51  ;;  %v610_v51 = vld [vmem:[#allocation2 + $0x68] sm:$0xff] }
  0xac   : > { %1710 = vmatpush3.bf16.msra.mxu0 %v1894_v38  ;;  %1749 = vmatprep.subr.bf16.mxu1 %v1906_v52 }
  0xad   : > { %1711 = vmatprep.subr.bf16.mxu0 %v1895_v41 }
  0xaf   : > { %1750 = vmatpush3.bf16.msra.mxu1 %v1906_v52 }
  0xb0   : > { %1712 = vmatpush3.bf16.msra.mxu0 %v1895_v41  ;;  %1831 = vmatprep.subr.bf16.mxu1 %v1907_v53 }
  0xb1   : > { %1713 = vmatprep.subr.bf16.mxu0 %v1896_v43 }
  0xb4   : > { %1714 = vmatpush3.bf16.msra.mxu0 %v1896_v43 }
  0xb5   : > { %1715 = vmatprep.subr.bf16.mxu0 %v1897_v47 }
  0xb8   : > { %1716 = vmatpush3.bf16.msra.mxu0 %v1897_v47 }
  0xb9   : > { %1717 = vmatprep.subr.bf16.mxu0 %v1898_v48 }
  0xbc   : > { %1718 = vmatpush3.bf16.msra.mxu0 %v1898_v48  ;;  %v612_v48 = vld [vmem:[#allocation2 + $0x78] sm:$0xff] }
  0xbd   : > { %1767 = vmatprep.subr.bf16.mxu0 %v1907_v53 }
  0xbf   : > { %1720 = vmatmul.mubr.bf16.vlgmr.msra.gmra.mrb[0].mxu0 %v2075_v45 }
  0xc0   : > { %1723 = vmatprep.mubr.bf16.mxu0 %v2084_v55  ;;  %1768 = vmatpush3.bf16.msra.mxu0 %v1907_v53 }
  0xc1   : > { %1769 = vmatprep.subr.bf16.mxu0 %v1908_v54 }
  0xc4   : > { %1770 = vmatpush3.bf16.msra.mxu0 %v1908_v54 }
  0xc5   : > { %1771 = vmatprep.subr.bf16.mxu0 %v2181_v56 }
  0xc7   : > { %1724 = vmatmul.mubr.bf16.gmra.mrb[4].mxu0 %v2091_v1 }
  0xc8   : > { %1727 = vmatprep.mubr.bf16.mxu0 %v2098_v11  ;;  %1772 = vmatpush3.bf16.msra.mxu0 %v2181_v56 }
  0xc9   : > { %1773 = vmatprep.subr.bf16.mxu0 %v2187_v57 }
  0xcc   : > { %1774 = vmatpush3.bf16.msra.mxu0 %v2187_v57 }
  0xcd   : > { %1775 = vmatprep.subr.bf16.mxu0 %v2194_v58 }
  0xcf   : > { %1728 = vmatmul.mubr.bf16.gmra.mrb[8].mxu0 %v2105_v21 }
  0xd0   : > { %1731 = vmatprep.mubr.bf16.mxu0 %v2109_v30  ;;  %1776 = vmatpush3.bf16.msra.mxu0 %v2194_v58 }
  0xd1   : > { %1777 = vmatprep.subr.bf16.mxu0 %v2201_v59 }
  0xd4   : > { %1778 = vmatpush3.bf16.msra.mxu0 %v2201_v59 }
  0xd7   : > { %1732 = vmatmul.mubr.bf16.gmra.mrb[12].mxu0 %v2113_v35 }
 0x192   : > { %v1721_v62 = vpop.f32.mrb[0].mxu0 }
 0x193   : > { %v776_v0 = vadd.f32 %v1721_v62, %v599_v60  ;;  %v711_v2 = vpop.f32.mrb[1].mxu0  ;;  %v1913_v62 = vld [vmem:[%s2364_s6 + $0x30] sm:$0xff]  }
 0x194   : > { %v774_v4 = vadd.f32 %v711_v2, %v597_v61  ;;  %v1722_v5 = vpop.f32.mrb[2].mxu0  ;;  %1779 = vmatprep.subr.bf16.mxu0 %v1913_v62 }
 0x195   : > { %792 = vst [vmem:[#allocation2 + $0x10] sm:$0xff] %v776_v0  ;;  %v777_v6 = vadd.f32 %v1722_v5, %v600_v63  ;;  %v714_v7 = vpop.f32.mrb[3].mxu0  ;;  %1780 = vmatpush3.bf16.msra.mxu0 %v1913_v62 }
 0x196   : > { %790 = vst [vmem:[#allocation2] sm:$0xff] %v774_v4  ;;  %v775_v8 = vadd.f32 %v714_v7, %v598_v3 }
 0x197   : > { %793 = vst [vmem:[#allocation2 + $0x18] sm:$0xff] %v777_v6  ;;  %v826_v9 = vpack.c.bf16 %v777_v6, %v776_v0 }
 0x198   : > { %791 = vst [vmem:[#allocation2 + $0x8] sm:$0xff] %v775_v8  ;;  %v825_v12 = vpack.c.bf16 %v775_v8, %v774_v4 }
 0x19a   : > { %v1725_v14 = vpop.f32.mrb[4].mxu0  ;;  %1751 = vmatprep.mubr.bf16.mxu1 %v825_v12 }
 0x19b   : > { %v780_v16 = vadd.f32 %v1725_v14, %v603_v10  ;;  %v727_v17 = vpop.f32.mrb[5].mxu0  ;;  %1752 = vmatmul.mubr.bf16.vlgmr.msra.gmra.mrb[0].mxu1 %v826_v9 }
 0x19c   : > { %v778_v19 = vadd.f32 %v727_v17, %v601_v13  ;;  %v1726_v20 = vpop.f32.mrb[6].mxu0  ;;  %1839 = vmatpush3.bf16.msra.mxu1 %v1907_v53 }
 0x19d   : > { %796 = vst [vmem:[#allocation2 + $0x30] sm:$0xff] %v780_v16  ;;  %v781_v22 = vadd.f32 %v1726_v20, %v604_v15  ;;  %v730_v23 = vpop.f32.mrb[7].mxu0  ;;  %1832 = vmatprep.subr.bf16.mxu1 %v1908_v54 }
 0x19e   : > { %794 = vst [vmem:[#allocation2 + $0x20] sm:$0xff] %v778_v19  ;;  %v779_v24 = vadd.f32 %v730_v23, %v602_v18 }
 0x19f   : > { %797 = vst [vmem:[#allocation2 + $0x38] sm:$0xff] %v781_v22  ;;  %v828_v25 = vpack.c.bf16 %v781_v22, %v780_v16 }
 0x1a0   : > { %795 = vst [vmem:[#allocation2 + $0x28] sm:$0xff] %v779_v24  ;;  %v827_v27 = vpack.c.bf16 %v779_v24, %v778_v19  ;;  %1840 = vmatpush3.bf16.msra.mxu1 %v1908_v54 }
 0x1a1   : > { %1833 = vmatprep.subr.bf16.mxu1 %v2181_v56 }
 0x1a2   : > { %v1729_v31 = vpop.f32.mrb[8].mxu0  ;;  %1755 = vmatprep.mubr.bf16.mxu1 %v827_v27 }
 0x1a3   : > { %v784_v33 = vadd.f32 %v1729_v31, %v607_v26  ;;  %v743_v34 = vpop.f32.mrb[9].mxu0  ;;  %1756 = vmatmul.mubr.bf16.gmra.mrb[4].mxu1 %v828_v25 }
 0x1a4   : > { %v782_v37 = vadd.f32 %v743_v34, %v605_v28  ;;  %v1730_v29 = vpop.f32.mrb[10].mxu0  ;;  %1841 = vmatpush3.bf16.msra.mxu1 %v2181_v56 }
 0x1a5   : > { %800 = vst [vmem:[#allocation2 + $0x50] sm:$0xff] %v784_v33  ;;  %v785_v38 = vadd.f32 %v1730_v29, %v608_v32  ;;  %v746_v39 = vpop.f32.mrb[11].mxu0  ;;  %1834 = vmatprep.subr.bf16.mxu1 %v2187_v57 }
 0x1a6   : > { %798 = vst [vmem:[#allocation2 + $0x40] sm:$0xff] %v782_v37  ;;  %v783_v40 = vadd.f32 %v746_v39, %v606_v36 }
 0x1a7   : > { %801 = vst [vmem:[#allocation2 + $0x58] sm:$0xff] %v785_v38  ;;  %v830_v41 = vpack.c.bf16 %v785_v38, %v784_v33 }
 0x1a8   : > { %799 = vst [vmem:[#allocation2 + $0x48] sm:$0xff] %v783_v40  ;;  %v829_v43 = vpack.c.bf16 %v783_v40, %v782_v37  ;;  %1842 = vmatpush3.bf16.msra.mxu1 %v2187_v57 }
 0x1a9   : > { %1835 = vmatprep.subr.bf16.mxu1 %v2194_v58 }
 0x1aa   : > { %v1733_v47 = vpop.f32.mrb[12].mxu0  ;;  %1759 = vmatprep.mubr.bf16.mxu1 %v829_v43 }
 0x1ab   : > { %v788_v49 = vadd.f32 %v1733_v47, %v611_v42  ;;  %v759_v50 = vpop.f32.mrb[13].mxu0  ;;  %1760 = vmatmul.mubr.bf16.gmra.mrb[8].mxu1 %v830_v41 }
 0x1ac   : > { %v786_v52 = vadd.f32 %v759_v50, %v609_v44  ;;  %v1734_v53 = vpop.f32.mrb[14].mxu0  ;;  %1843 = vmatpush3.bf16.msra.mxu1 %v2194_v58  ;;  %v1914_v58 = vld [vmem:[%s2364_s6 + $0x38] sm:$0xff]  }
 0x1ad   : > { %804 = vst [vmem:[#allocation2 + $0x70] sm:$0xff] %v788_v49  ;;  %v789_v54 = vadd.f32 %v1734_v53, %v612_v48  ;;  %v762_v56 = vpop.f32.mrb[15].mxu0  ;;  %1836 = vmatprep.subr.bf16.mxu1 %v2201_v59  ;;  %1781 = vmatprep.subr.bf16.mxu0 %v1914_v58 }
 0x1ae   : > { %802 = vst [vmem:[#allocation2 + $0x60] sm:$0xff] %v786_v52  ;;  %v787_v57 = vadd.f32 %v762_v56, %v610_v51  ;;  %1782 = vmatpush3.bf16.msra.mxu0 %v1914_v58 }
 0x1af   : > { %805 = vst [vmem:[#allocation2 + $0x78] sm:$0xff] %v789_v54  ;;  %v832_v60 = vpack.c.bf16 %v789_v54, %v788_v49 }
 0x1b0   : > { %803 = vst [vmem:[#allocation2 + $0x68] sm:$0xff] %v787_v57  ;;  %v831_v61 = vpack.c.bf16 %v787_v57, %v786_v52  ;;  %1844 = vmatpush3.bf16.msra.mxu1 %v2201_v59  ;;  %v1577_v59 = vld [vmem:[%s2363_s5] ss:$0 sm:$0xff] }
 0x1b1   : > { %1837 = vmatprep.subr.bf16.mxu1 %v1913_v62 }
 0x1b2   : > { %1763 = vmatprep.mubr.bf16.mxu1 %v831_v61 }
 0x1b3   : > { %1764 = vmatmul.mubr.bf16.gmra.mrb[12].mxu1 %v832_v60 }
 0x1b4   : > { %1845 = vmatpush3.bf16.msra.mxu1 %v1913_v62 }
 0x1b5   : > { %1838 = vmatprep.subr.bf16.mxu1 %v1914_v58 }
 0x1b8   : > { %1846 = vmatpush3.bf16.msra.mxu1 %v1914_v58 }
 0x26e   : > { %v1753_v63 = vpop.f32.mrb[0].mxu1 }
 0x26f   : > { %v947_v0 = vadd.f32 %v1753_v63, %v1577_v59  ;;  %v938_v2 = vpop.f32.mrb[1].mxu1 }
 0x270   : > { %v939_v3 = vadd.f32 %v1577_v59, %v938_v2  ;;  %v1754_v4 = vpop.f32.mrb[2].mxu1 }
 0x271   : > { %v950_v5 = vadd.f32 %v1754_v4, %v1577_v59  ;;  %v941_v6 = vpop.f32.mrb[3].mxu1  ;;  %v1003_v8 = vmax.f32 %v947_v0, 0.0 }
 0x272   : > { %v942_v7 = vadd.f32 %v1577_v59, %v941_v6  ;;  %v1001_v10 = vmax.f32 %v939_v3, 0.0 }
 0x273   : > { %v1004_v9 = vmax.f32 %v950_v5, 0.0 }
 0x274   : > { %v1002_v12 = vmax.f32 %v942_v7, 0.0 }
 0x275   : > { %v1018_v13 = vpack.c.bf16 %v1004_v9, %v1003_v8 }
 0x276   : > { %v1017_v14 = vpack.c.bf16 %v1002_v12, %v1001_v10  ;;  %v1757_v15 = vpop.f32.mrb[4].mxu1 }
 0x277   : > { %v963_v16 = vadd.f32 %v1757_v15, %v1577_v59  ;;  %v954_v17 = vpop.f32.mrb[5].mxu1 }
 0x278   : > { %v955_v18 = vadd.f32 %v1577_v59, %v954_v17  ;;  %v1758_v19 = vpop.f32.mrb[6].mxu1  ;;  %1783 = vmatprep.mubr.bf16.mxu0 %v1017_v14 }
 0x279   : > { %v966_v20 = vadd.f32 %v1758_v19, %v1577_v59  ;;  %v957_v22 = vpop.f32.mrb[7].mxu1  ;;  %1784 = vmatmul.mubr.bf16.vlgmr.msra.gmra.mrb[16].mxu0 %v1018_v13  ;;  %v1007_v24 = vmax.f32 %v963_v16, 0.0 }
 0x27a   : > { %v958_v23 = vadd.f32 %v1577_v59, %v957_v22  ;;  %v1005_v26 = vmax.f32 %v955_v18, 0.0 }
 0x27b   : > { %v1008_v25 = vmax.f32 %v966_v20, 0.0 }
 0x27c   : > { %v1006_v27 = vmax.f32 %v958_v23, 0.0 }
 0x27d   : > { %v1020_v28 = vpack.c.bf16 %v1008_v25, %v1007_v24 }
 0x27e   : > { %v1019_v31 = vpack.c.bf16 %v1006_v27, %v1005_v26  ;;  %v1761_v32 = vpop.f32.mrb[8].mxu1 }
 0x27f   : > { %v979_v33 = vadd.f32 %v1761_v32, %v1577_v59  ;;  %v970_v34 = vpop.f32.mrb[9].mxu1 }
 0x280   : > { %v971_v36 = vadd.f32 %v1577_v59, %v970_v34  ;;  %v1762_v37 = vpop.f32.mrb[10].mxu1  ;;  %1787 = vmatprep.mubr.bf16.mxu0 %v1019_v31 }
 0x281   : > { %v982_v29 = vadd.f32 %v1762_v37, %v1577_v59  ;;  %v973_v38 = vpop.f32.mrb[11].mxu1  ;;  %1788 = vmatmul.mubr.bf16.gmra.mrb[20].mxu0 %v1020_v28  ;;  %v1011_v40 = vmax.f32 %v979_v33, 0.0 }
 0x282   : > { %v974_v39 = vadd.f32 %v1577_v59, %v973_v38  ;;  %v1009_v42 = vmax.f32 %v971_v36, 0.0 }
 0x283   : > { %v1012_v41 = vmax.f32 %v982_v29, 0.0 }
 0x284   : > { %v1010_v43 = vmax.f32 %v974_v39, 0.0 }
 0x285   : > { %v1022_v44 = vpack.c.bf16 %v1012_v41, %v1011_v40 }
 0x286   : > { %v1021_v47 = vpack.c.bf16 %v1010_v43, %v1009_v42  ;;  %v1765_v48 = vpop.f32.mrb[12].mxu1 }
 0x287   : > { %v995_v49 = vadd.f32 %v1765_v48, %v1577_v59  ;;  %v986_v50 = vpop.f32.mrb[13].mxu1 }
 0x288   : > { %v987_v51 = vadd.f32 %v1577_v59, %v986_v50  ;;  %v1766_v52 = vpop.f32.mrb[14].mxu1  ;;  %1791 = vmatprep.mubr.bf16.mxu1 %v1021_v47 }
 0x289   : > { %v998_v53 = vadd.f32 %v1766_v52, %v1577_v59  ;;  %v989_v54 = vpop.f32.mrb[15].mxu1  ;;  %1792 = vmatmul.mubr.bf16.vlgmr.msra.gmra.mrb[16].mxu1 %v1022_v44  ;;  %v1015_v57 = vmax.f32 %v995_v49, 0.0 }
 0x28a   : > { %v990_v56 = vadd.f32 %v1577_v59, %v989_v54  ;;  %v1013_v61 = vmax.f32 %v987_v51, 0.0 }
 0x28b   : > { %v1016_v60 = vmax.f32 %v998_v53, 0.0 }
 0x28c   : > { %v1014_v62 = vmax.f32 %v990_v56, 0.0 }
 0x28d   : > { %v1024_v58 = vpack.c.bf16 %v1016_v60, %v1015_v57 }
 0x28e   : > { %v1023_v63 = vpack.c.bf16 %v1014_v62, %v1013_v61 }
 0x290   : > { %1795 = vmatprep.mubr.bf16.mxu1 %v1023_v63 }
 0x291   : > { %1796 = vmatmul.mubr.bf16.gmra.mrb[20].mxu1 %v1024_v58 }
 0x34c   : > { %v1785_v0 = vpop.f32.mrb[16].mxu0 }
 0x34d   : > { %1209 = vst [vmem:[%s2366_s8 + $0x10] sm:$0xff] %v1785_v0  ;;  %v1123_v2 = vpop.f32.mrb[17].mxu0 }
 0x34e   : > { %1207 = vst [vmem:[%s2366_s8] sm:$0xff] %v1123_v2  ;;  %v1786_v3 = vpop.f32.mrb[18].mxu0 }
 0x34f   : > { %v1188_v59 = vpack.c.bf16 %v1786_v3, %v1785_v0  ;;  %1210 = vst [vmem:[%s2366_s8 + $0x18] sm:$0xff] %v1786_v3  ;;  %v1126_v4 = vpop.f32.mrb[19].mxu0 }
 0x350   : > { %v1187_v5 = vpack.c.bf16 %v1126_v4, %v1123_v2  ;;  %1208 = vst [vmem:[%s2366_s8 + $0x8] sm:$0xff] %v1126_v4 }
 0x351   : > { %1200 = vst [vmem:[#allocation3 + $0x8] sm:$0xff] %v1188_v59 }
 0x352   : > { %1199 = vst [vmem:[#allocation3] sm:$0xff] %v1187_v5 }
 0x354   : > { %v1789_v6 = vpop.f32.mrb[20].mxu0 }
 0x355   : > { %1213 = vst [vmem:[%s2366_s8 + $0x30] sm:$0xff] %v1789_v6  ;;  %v1139_v7 = vpop.f32.mrb[21].mxu0 }
 0x356   : > { %1211 = vst [vmem:[%s2366_s8 + $0x20] sm:$0xff] %v1139_v7  ;;  %v1790_v8 = vpop.f32.mrb[22].mxu0 }
 0x357   : > { %v1190_v9 = vpack.c.bf16 %v1790_v8, %v1789_v6  ;;  %1214 = vst [vmem:[%s2366_s8 + $0x38] sm:$0xff] %v1790_v8  ;;  %v1142_v10 = vpop.f32.mrb[23].mxu0 }
 0x358   : > { %v1189_v12 = vpack.c.bf16 %v1142_v10, %v1139_v7  ;;  %1212 = vst [vmem:[%s2366_s8 + $0x28] sm:$0xff] %v1142_v10 }
 0x359   : > { %1202 = vst [vmem:[#allocation3 + $0x18] sm:$0xff] %v1190_v9 }
 0x35a   : > { %1201 = vst [vmem:[#allocation3 + $0x10] sm:$0xff] %v1189_v12 }
 0x35c   : > { %v1793_v13 = vpop.f32.mrb[16].mxu1 }
 0x35d   : > { %1217 = vst [vmem:[%s2366_s8 + $0x50] sm:$0xff] %v1793_v13  ;;  %v1155_v14 = vpop.f32.mrb[17].mxu1 }
 0x35e   : > { %1215 = vst [vmem:[%s2366_s8 + $0x40] sm:$0xff] %v1155_v14  ;;  %v1794_v15 = vpop.f32.mrb[18].mxu1 }
 0x35f   : > { %v1192_v16 = vpack.c.bf16 %v1794_v15, %v1793_v13  ;;  %1218 = vst [vmem:[%s2366_s8 + $0x58] sm:$0xff] %v1794_v15  ;;  %v1158_v17 = vpop.f32.mrb[19].mxu1 }
 0x360   : > { %v1191_v18 = vpack.c.bf16 %v1158_v17, %v1155_v14  ;;  %1216 = vst [vmem:[%s2366_s8 + $0x48] sm:$0xff] %v1158_v17 }
 0x361   : > { %1204 = vst [vmem:[#allocation3 + $0x28] sm:$0xff] %v1192_v16 }
 0x362   : > { %1203 = vst [vmem:[#allocation3 + $0x20] sm:$0xff] %v1191_v18 }
 0x364   : > { %v1797_v19 = vpop.f32.mrb[20].mxu1 }
 0x365   : > { %1221 = vst [vmem:[%s2366_s8 + $0x70] sm:$0xff] %v1797_v19  ;;  %v1171_v20 = vpop.f32.mrb[21].mxu1 }
 0x366   : > { %1219 = vst [vmem:[%s2366_s8 + $0x60] sm:$0xff] %v1171_v20  ;;  %v1798_v22 = vpop.f32.mrb[22].mxu1 }
 0x367   : > { %v1194_v23 = vpack.c.bf16 %v1798_v22, %v1797_v19  ;;  %1222 = vst [vmem:[%s2366_s8 + $0x78] sm:$0xff] %v1798_v22  ;;  %v1174_v24 = vpop.f32.mrb[23].mxu1 }
 0x368   : > { %v1193_v25 = vpack.c.bf16 %v1174_v24, %v1171_v20  ;;  %1220 = vst [vmem:[%s2366_s8 + $0x68] sm:$0xff] %v1174_v24 }
 0x369   : > { %1206 = vst [vmem:[#allocation3 + $0x38] sm:$0xff] %v1194_v23 }
 0x36a   : > { %1205 = vst [vmem:[#allocation3 + $0x30] sm:$0xff] %v1193_v25 }
 0x36b PF: > { %p1594_p5 = scmp.ne.s32.totalorder %s1929_s27, 1 }
 0x36c   : > { %v1248_v26 = vld [vmem:[#allocation3] sm:$0xff] (!%p1594_p5)  ;;  %v1249_v27 = vld [vmem:[#allocation3 + $0x8] sm:$0xff] (!%p1594_p5)  ;;  %1815 = vmatprep.mubr.bf16.mxu0 (!%p1594_p5), %v2077_v46  ;;  %1823 = vmatprep.mubr.bf16.mxu1 (!%p1594_p5), %v2098_v11  ;;  %v1250_v28 = vld [vmem:[#allocation3 + $0x10] sm:$0xff] (!%p1594_p5) }
 0x36d   : > { %1226 = sbr.rel (%p1594_p5) target bundleno = 1139 (0x473), region = 68  ;;  %1799 = vmatprep.subr.bf16.mxu0 (!%p1594_p5), %v1248_v26  ;;  %1847 = vmatprep.subr.bf16.mxu1 (!%p1594_p5), %v1248_v26  ;;  %v1251_v31 = vld [vmem:[#allocation3 + $0x18] sm:$0xff] (!%p1594_p5)  ;;  %v1252_v32 = vld [vmem:[#allocation3 + $0x20] sm:$0xff] (!%p1594_p5)  ;;  %v1253_v46 = vld [vmem:[#allocation3 + $0x28] sm:$0xff] (!%p1594_p5) }
 0x36e   : > { %1800 = vmatpush3.bf16.msra.mxu0 (!%p1594_p5), %v1248_v26  ;;  %1855 = vmatpush3.bf16.msra.mxu1 (!%p1594_p5), %v1248_v26  ;;  %v1230_v34 = vld [vmem:[#allocation2 + $0x10] sm:$0xff] (!%p1594_p5)  ;;  %v1228_v37 = vld [vmem:[#allocation2] sm:$0xff] (!%p1594_p5)  ;;  %v1239_v40 = vld [vmem:[#allocation2 + $0x58] sm:$0xff] (!%p1594_p5) }
 0x36f   : > { %1801 = vmatprep.subr.bf16.mxu0 (!%p1594_p5), %v1249_v27  ;;  %1848 = vmatprep.subr.bf16.mxu1 (!%p1594_p5), %v1249_v27  ;;  %v1238_v36 = vld [vmem:[#allocation2 + $0x50] sm:$0xff] (!%p1594_p5)  ;;  %v1236_v29 = vld [vmem:[#allocation2 + $0x40] sm:$0xff] (!%p1594_p5)  ;;  %v1237_v43 = vld [vmem:[#allocation2 + $0x48] sm:$0xff] (!%p1594_p5) }
 0x370   : > { %v1255_v33 = vld [vmem:[#allocation3 + $0x38] sm:$0xff] (!%p1594_p5)  ;;  %v2283_v39 = vld [vmem:[%s2365_s7] ss:$0 sm:$0xff] (!%p1594_p5)  ;;  %v1234_v2 = vld [vmem:[#allocation2 + $0x30] sm:$0xff] (!%p1594_p5) }
 0x371   : > { %v1254_v11 = vld [vmem:[#allocation3 + $0x30] sm:$0xff] (!%p1594_p5)  ;;  %v1232_v59 = vld [vmem:[#allocation2 + $0x20] sm:$0xff] (!%p1594_p5)  ;;  %v1235_v7 = vld [vmem:[#allocation2 + $0x38] sm:$0xff] (!%p1594_p5) }
 0x372   : > { %1802 = vmatpush3.bf16.msra.mxu0 (!%p1594_p5), %v1249_v27  ;;  %1856 = vmatpush3.bf16.msra.mxu1 (!%p1594_p5), %v1249_v27  ;;  %v1242_v3 = vld [vmem:[#allocation2 + $0x70] sm:$0xff] (!%p1594_p5)  ;;  %v1240_v4 = vld [vmem:[#allocation2 + $0x60] sm:$0xff] (!%p1594_p5)  ;;  %v1243_v8 = vld [vmem:[#allocation2 + $0x78] sm:$0xff] (!%p1594_p5) }
 0x373   : > { %1803 = vmatprep.subr.bf16.mxu0 (!%p1594_p5), %v1250_v28  ;;  %1849 = vmatprep.subr.bf16.mxu1 (!%p1594_p5), %v1250_v28  ;;  %v1233_v14 = vld [vmem:[#allocation2 + $0x28] sm:$0xff] (!%p1594_p5) }
 0x374   : > { %v1241_v15 = vld [vmem:[#allocation2 + $0x68] sm:$0xff] }
 0x376   : > { %1804 = vmatpush3.bf16.msra.mxu0 %v1250_v28  ;;  %1857 = vmatpush3.bf16.msra.mxu1 %v1250_v28 }
 0x377   : > { %1805 = vmatprep.subr.bf16.mxu0 %v1251_v31  ;;  %1850 = vmatprep.subr.bf16.mxu1 %v1251_v31 }
 0x37a   : > { %1806 = vmatpush3.bf16.msra.mxu0 %v1251_v31  ;;  %1858 = vmatpush3.bf16.msra.mxu1 %v1251_v31 }
 0x37b   : > { %1807 = vmatprep.subr.bf16.mxu0 %v1252_v32  ;;  %1851 = vmatprep.subr.bf16.mxu1 %v1252_v32 }
 0x37e   : > { %1808 = vmatpush3.bf16.msra.mxu0 %v1252_v32  ;;  %1859 = vmatpush3.bf16.msra.mxu1 %v1252_v32 }
 0x37f   : > { %1809 = vmatprep.subr.bf16.mxu0 %v1253_v46  ;;  %1852 = vmatprep.subr.bf16.mxu1 %v1253_v46 }
 0x382   : > { %1810 = vmatpush3.bf16.msra.mxu0 %v1253_v46  ;;  %1860 = vmatpush3.bf16.msra.mxu1 %v1253_v46 }
 0x383   : > { %1811 = vmatprep.subr.bf16.mxu0 %v1254_v11  ;;  %1853 = vmatprep.subr.bf16.mxu1 %v1254_v11 }
 0x386   : > { %1812 = vmatpush3.bf16.msra.mxu0 %v1254_v11  ;;  %1861 = vmatpush3.bf16.msra.mxu1 %v1254_v11 }
 0x387   : > { %1813 = vmatprep.subr.bf16.mxu0 %v1255_v33  ;;  %1854 = vmatprep.subr.bf16.mxu1 %v1255_v33 }
 0x38a   : > { %1814 = vmatpush3.bf16.msra.mxu0 %v1255_v33  ;;  %1862 = vmatpush3.bf16.msra.mxu1 %v1255_v33 }
 0x38d   : > { %1816 = vmatmul.mubr.bf16.vlgmr.msra.gmra.mrb[0].mxu0 %v2075_v45  ;;  %1824 = vmatmul.mubr.bf16.vlgmr.msra.gmra.mrb[0].mxu1 %v2105_v21  ;;  %v1231_v21 = vld [vmem:[#allocation2 + $0x18] sm:$0xff] }
 0x38e   : > { %1819 = vmatprep.mubr.bf16.mxu0 %v2084_v55  ;;  %1827 = vmatprep.mubr.bf16.mxu1 %v2109_v30 }
 0x395   : > { %1820 = vmatmul.mubr.bf16.gmra.mrb[4].mxu0 %v2091_v1  ;;  %1828 = vmatmul.mubr.bf16.gmra.mrb[4].mxu1 %v2113_v35  ;;  %v1229_v1 = vld [vmem:[#allocation2 + $0x8] sm:$0xff] }
 0x460   : > { %v1817_v38 = vpop.f32.mrb[0].mxu0  ;;  %v1825_v45 = vpop.f32.mrb[0].mxu1 }
 0x461   : > { %v1355_v55 = vadd.f32 %v1817_v38, %v1230_v34  ;;  %v1363_v41 = vadd.f32 %v1825_v45, %v1238_v36  ;;  %v1290_v30 = vpop.f32.mrb[1].mxu0  ;;  %v1322_v42 = vpop.f32.mrb[1].mxu1 }
 0x462   : > { %v1353_v35 = vadd.f32 %v1290_v30, %v1228_v37  ;;  %v1361_v44 = vadd.f32 %v1322_v42, %v1236_v29  ;;  %v1818_v47 = vpop.f32.mrb[2].mxu0  ;;  %v1826_v48 = vpop.f32.mrb[2].mxu1 }
 0x463   : > { %1371 = vst [vmem:[#allocation2 + $0x10] sm:$0xff] %v1355_v55  ;;  %v1413_v49 = vadd.f32 %v2283_v39, %v1355_v55  ;;  %1379 = vst [vmem:[#allocation2 + $0x50] sm:$0xff] %v1363_v41  ;;  %v1421_v50 = vadd.f32 %v2283_v39, %v1363_v41  ;;  %v1356_v51 = vadd.f32 %v1818_v47, %v1231_v21  ;;  %v1293_v53 = vpop.f32.mrb[3].mxu0  ;;  %v1325_v54 = vpop.f32.mrb[3].mxu1 }
 0x464   : > { %v1364_v52 = vadd.f32 %v1826_v48, %v1239_v40  ;;  %1369 = vst [vmem:[#allocation2] sm:$0xff] %v1353_v35  ;;  %v1411_v56 = vadd.f32 %v2283_v39, %v1353_v35  ;;  %1377 = vst [vmem:[#allocation2 + $0x40] sm:$0xff] %v1361_v44  ;;  %v1419_v57 = vadd.f32 %v2283_v39, %v1361_v44 }
 0x465   : > { %v1354_v60 = vadd.f32 %v1293_v53, %v1229_v1  ;;  %v1362_v61 = vadd.f32 %v1325_v54, %v1237_v43  ;;  %1429 = vst [vmem:[%s2366_s8 + $0x10] sm:$0xff] %v1413_v49  ;;  %1437 = vst [vmem:[%s2366_s8 + $0x50] sm:$0xff] %v1421_v50  ;;  %v1414_v62 = vadd.f32 %v2283_v39, %v1356_v51 }
 0x466   : > { %1372 = vst [vmem:[#allocation2 + $0x18] sm:$0xff] %v1356_v51  ;;  %1380 = vst [vmem:[#allocation2 + $0x58] sm:$0xff] %v1364_v52  ;;  %v1422_v58 = vadd.f32 %v2283_v39, %v1364_v52 }
 0x467   : > { %1427 = vst [vmem:[%s2366_s8] sm:$0xff] %v1411_v56  ;;  %1435 = vst [vmem:[%s2366_s8 + $0x40] sm:$0xff] %v1419_v57  ;;  %v1412_v63 = vadd.f32 %v2283_v39, %v1354_v60  ;;  %v1420_v0 = vadd.f32 %v2283_v39, %v1362_v61 }
 0x468   : > { %1370 = vst [vmem:[#allocation2 + $0x8] sm:$0xff] %v1354_v60  ;;  %1378 = vst [vmem:[#allocation2 + $0x48] sm:$0xff] %v1362_v61  ;;  %v1821_v5 = vpop.f32.mrb[4].mxu0  ;;  %v1829_v6 = vpop.f32.mrb[4].mxu1 }
 0x469   : > { %1430 = vst [vmem:[%s2366_s8 + $0x18] sm:$0xff] %v1414_v62  ;;  %1438 = vst [vmem:[%s2366_s8 + $0x58] sm:$0xff] %v1422_v58  ;;  %v1359_v9 = vadd.f32 %v1821_v5, %v1234_v2  ;;  %v1367_v10 = vadd.f32 %v1829_v6, %v1242_v3  ;;  %v1306_v12 = vpop.f32.mrb[5].mxu0  ;;  %v1338_v13 = vpop.f32.mrb[5].mxu1 }
 0x46a   : > { %1428 = vst [vmem:[%s2366_s8 + $0x8] sm:$0xff] %v1412_v63  ;;  %1436 = vst [vmem:[%s2366_s8 + $0x48] sm:$0xff] %v1420_v0  ;;  %v1357_v16 = vadd.f32 %v1306_v12, %v1232_v59  ;;  %v1365_v17 = vadd.f32 %v1338_v13, %v1240_v4  ;;  %v1822_v18 = vpop.f32.mrb[6].mxu0  ;;  %v1830_v19 = vpop.f32.mrb[6].mxu1 }
 0x46b   : > { %1375 = vst [vmem:[#allocation2 + $0x30] sm:$0xff] %v1359_v9  ;;  %v1417_v20 = vadd.f32 %v2283_v39, %v1359_v9  ;;  %1383 = vst [vmem:[#allocation2 + $0x70] sm:$0xff] %v1367_v10  ;;  %v1425_v22 = vadd.f32 %v2283_v39, %v1367_v10  ;;  %v1360_v23 = vadd.f32 %v1822_v18, %v1235_v7  ;;  %v1309_v25 = vpop.f32.mrb[7].mxu0  ;;  %v1341_v26 = vpop.f32.mrb[7].mxu1 }
 0x46c   : > { %v1368_v24 = vadd.f32 %v1830_v19, %v1243_v8  ;;  %1373 = vst [vmem:[#allocation2 + $0x20] sm:$0xff] %v1357_v16  ;;  %v1415_v27 = vadd.f32 %v2283_v39, %v1357_v16  ;;  %1381 = vst [vmem:[#allocation2 + $0x60] sm:$0xff] %v1365_v17  ;;  %v1423_v28 = vadd.f32 %v2283_v39, %v1365_v17 }
 0x46d   : > { %v1358_v31 = vadd.f32 %v1309_v25, %v1233_v14  ;;  %v1366_v32 = vadd.f32 %v1341_v26, %v1241_v15  ;;  %1433 = vst [vmem:[%s2366_s8 + $0x30] sm:$0xff] %v1417_v20  ;;  %1441 = vst [vmem:[%s2366_s8 + $0x70] sm:$0xff] %v1425_v22  ;;  %v1418_v46 = vadd.f32 %v2283_v39, %v1360_v23 }
 0x46e   : > { %1376 = vst [vmem:[#allocation2 + $0x38] sm:$0xff] %v1360_v23  ;;  %1384 = vst [vmem:[#allocation2 + $0x78] sm:$0xff] %v1368_v24  ;;  %v1426_v11 = vadd.f32 %v2283_v39, %v1368_v24 }
 0x46f   : > { %1431 = vst [vmem:[%s2366_s8 + $0x20] sm:$0xff] %v1415_v27  ;;  %1439 = vst [vmem:[%s2366_s8 + $0x60] sm:$0xff] %v1423_v28  ;;  %v1416_v33 = vadd.f32 %v2283_v39, %v1358_v31  ;;  %v1424_v34 = vadd.f32 %v2283_v39, %v1366_v32 }
 0x470   : > { %1374 = vst [vmem:[#allocation2 + $0x28] sm:$0xff] %v1358_v31  ;;  %1382 = vst [vmem:[#allocation2 + $0x68] sm:$0xff] %v1366_v32 }
 0x471   : > { %1434 = vst [vmem:[%s2366_s8 + $0x38] sm:$0xff] %v1418_v46  ;;  %1442 = vst [vmem:[%s2366_s8 + $0x78] sm:$0xff] %v1426_v11 }
 0x472   : > { %1432 = vst [vmem:[%s2366_s8 + $0x28] sm:$0xff] %v1416_v33  ;;  %1440 = vst [vmem:[%s2366_s8 + $0x68] sm:$0xff] %v1424_v34 }
 0x473 PF: > { %s18_s29 = sadd.s32 1, %s1937_s29   ;;  %s2367_s27 = smov %s1933_s28 }
 0x474   : > { %p15_p6 = scmp.ge.s32.totalorder %s18_s29, 4   ;;  %s2368_s28 = smov %s2370_s30 }
 0x476   :  { %17 = sbr.rel (!%p15_p6) target bundleno = 2 (0x2), region = 113 }

</bundles_post_ra>
